<compile_context>
chip_gen: v6e
topology: v6e:2x2x1
jax: 0.10.0
libtpu: 0.0.40
codegen_flags: <defaults>
</compile_context>

<pallas_src>
import jax
import jax.numpy as jnp
from jax.experimental import pallas as pl
from jax.experimental.pallas import tpu as pltpu

_MAX_DMA_CHUNKS = 8           # a handful of concurrent DMA streams
_MIN_CHUNK_BYTES = 1 << 20    # don't bother splitting below ~1 MiB per stream


def _flatten_shape(shape, start_dim, end_dim):
    """Replicates torch.Tensor.flatten shape semantics (incl. negative dims)."""
    ndim = len(shape)
    if ndim == 0:
        return (1,)

    def norm(d):
        nd = d + ndim if d < 0 else d
        if not 0 <= nd < ndim:
            raise ValueError(f"flatten dim {d} out of range for {ndim}-D input")
        return nd

    s, e = norm(start_dim), norm(end_dim)
    if s > e:
        raise ValueError("start_dim must be <= end_dim")
    merged = 1
    for d in shape[s:e + 1]:
        merged *= d
    return tuple(shape[:s]) + (merged,) + tuple(shape[e + 1:])


def _row_chunks(shape, itemsize):
    """Static (offset, rows) chunks along axis 0 for concurrent HBM->HBM DMAs.

    Returns () when a single whole-array DMA is the right call (small array,
    rank < 2, or a leading dim that cannot usefully be split).
    """
    if len(shape) < 2 or shape[0] < 2:
        return ()
    total_bytes = itemsize
    for d in shape:
        total_bytes *= d
    n = min(_MAX_DMA_CHUNKS, shape[0], max(1, total_bytes // _MIN_CHUNK_BYTES))
    if n <= 1:
        return ()
    # For 2-D inputs axis 0 is the sublane dim: keep chunk starts 8-aligned.
    align = 8 if len(shape) == 2 else 1
    rows = shape[0]
    per = -(-rows // n)
    per = -(-per // align) * align
    chunks, off = [], 0
    while off < rows:
        r = min(per, rows - off)
        chunks.append((off, r))
        off += r
    return tuple(chunks) if len(chunks) > 1 else ()


def _make_copy_kernel(chunks):
    """Build an HBM->HBM DMA copy kernel for a static chunk plan."""

    def kernel(x_ref, o_ref, sem):
        if not chunks:
            # Single whole-array DMA: legal for any shape/dtype, no alignment
            # requirements, no VMEM involved.
            cp = pltpu.make_async_copy(x_ref, o_ref, sem.at[0])
            cp.start()
            cp.wait()
            return
        # Start all chunk DMAs (concurrent streams across DMA engines), then
        # wait for all of them.
        started = []
        for i, (off, rows) in enumerate(chunks):
            cp = pltpu.make_async_copy(
                x_ref.at[pl.ds(off, rows)],
                o_ref.at[pl.ds(off, rows)],
                sem.at[i],
            )
            cp.start()
            started.append(cp)
        for cp in started:
            cp.wait()

    return kernel


def pallas_flatten(x, start_dim=0, end_dim=-1, *, copy=True):
    """Flatten `x` like torch.flatten(start_dim, end_dim).

    With copy=True (default) the data is materialized into a fresh buffer via
    a Pallas HBM->HBM DMA copy kernel; with copy=False it is a metadata-only
    reshape (the optimal path when a fresh buffer is not required).
    """
    out_shape = _flatten_shape(x.shape, start_dim, end_dim)

    if not copy or x.size == 0 or x.ndim == 0:
        # Metadata-only fast path (also covers empty / scalar inputs).
        return jnp.reshape(x, out_shape)

    itemsize = jnp.dtype(x.dtype).itemsize
    total = x.size
    chunks = _row_chunks(x.shape, itemsize)
    n_sems = max(1, len(chunks))

    y = pl.pallas_call(
        _make_copy_kernel(chunks),
        out_shape=jax.ShapeDtypeStruct(x.shape, x.dtype),
        in_specs=[pl.BlockSpec(memory_space=pl.ANY)],    # raw HBM ref, no auto-DMA
        out_specs=pl.BlockSpec(memory_space=pl.ANY),     # written only via DMA
        scratch_shapes=[pltpu.SemaphoreType.DMA((n_sems,))],
        cost_estimate=pl.CostEstimate(
            flops=0,
            transcendentals=0,
            bytes_accessed=2 * total * itemsize,
        ),
    )(x)

    # Metadata-only reshape of the freshly copied, contiguous buffer.
    return jnp.reshape(y, out_shape)


class Flatten:
    """Pallas/JAX counterpart of the PyTorch Flatten module."""

    def __init__(self, start_dim=0, end_dim=-1):
        self.start_dim = start_dim
        self.end_dim = end_dim

    def __call__(self, x):
        return pallas_flatten(x, self.start_dim, self.end_dim)


if __name__ == "__main__":
    key = jax.random.PRNGKey(0)

    # NCHW input consistent with the module's typical usage.
    x = jax.random.normal(key, (2, 4, 16, 16), dtype=jnp.float32)

    # Default module: Flatten() -> fully flatten to 1D (whole-array DMA path).
    y = jax.block_until_ready(Flatten()(x))
    ref = jnp.reshape(x, (-1,))
    assert y.shape == ref.shape and y.dtype == ref.dtype
    assert bool(jnp.all(y == ref))

    # Common Flatten(1, -1) usage (keep batch dim).
    y2 = jax.block_until_ready(Flatten(1, -1)(x))
    ref2 = jnp.reshape(x, (x.shape[0], -1))
    assert y2.shape == ref2.shape and bool(jnp.all(y2 == ref2))

    # Larger input exercising the multi-chunk concurrent-DMA path (4 streams).
    xl = jax.random.normal(jax.random.PRNGKey(1), (4, 16, 128, 128), jnp.float32)
    yl = jax.block_until_ready(pallas_flatten(xl, start_dim=1, end_dim=-1))
    refl = jnp.reshape(xl, (xl.shape[0], -1))
    assert yl.shape == refl.shape and bool(jnp.all(yl == refl))

    # bf16 input.
    xb = jax.random.normal(jax.random.PRNGKey(2), (2, 4, 16, 16)).astype(jnp.bfloat16)
    yb = jax.block_until_ready(pallas_flatten(xb))
    assert bool(jnp.all(yb == jnp.reshape(xb, (-1,))))

    # Non-lane-aligned size: no pad/slice anymore, just one whole-array DMA.
    xo = jax.random.normal(jax.random.PRNGKey(3), (3, 5, 7), dtype=jnp.float32)
    yo = jax.block_until_ready(pallas_flatten(xo, start_dim=1, end_dim=2))
    assert bool(jnp.all(yo == jnp.reshape(xo, (3, 35))))

    # Metadata-only fast path (no kernel).
    yf = jax.block_until_ready(pallas_flatten(x, copy=False))
    assert bool(jnp.all(yf == ref))

    print("KERNEL_OK")
</pallas_src>

<mosaic_0001>
module attributes {stable_mosaic.version = 11 : i64} {
  func.func @kernel(%arg0: memref<2x4x16x16xf32, #tpu.memory_space<any>>, %arg1: memref<2x4x16x16xf32, #tpu.memory_space<any>>, %arg2: memref<1x!tpu.dma_semaphore, #tpu.memory_space<semaphore_mem>>) attributes {dimension_semantics = [], scalar_prefetch = 0 : i64, scratch_operands = 1 : i64, tpu.core_type = #tpu.core_type<tc>} {
    %c0_i32 = arith.constant 0 : i32
    %0 = tpu.memref_slice %arg2[%c0_i32] : memref<1x!tpu.dma_semaphore, #tpu.memory_space<semaphore_mem>> -> memref<1x!tpu.dma_semaphore, #tpu.memory_space<semaphore_mem>>
    %1 = tpu.memref_squeeze %0 : memref<1x!tpu.dma_semaphore, #tpu.memory_space<semaphore_mem>> -> memref<!tpu.dma_semaphore, #tpu.memory_space<semaphore_mem>>
    tpu.enqueue_dma source(%arg0 : memref<2x4x16x16xf32, #tpu.memory_space<any>>) target(%arg1 : memref<2x4x16x16xf32, #tpu.memory_space<any>>) target_semaphore(%1 : memref<!tpu.dma_semaphore, #tpu.memory_space<semaphore_mem>>)
    %c0_i32_0 = arith.constant 0 : i32
    %2 = tpu.memref_slice %arg2[%c0_i32_0] : memref<1x!tpu.dma_semaphore, #tpu.memory_space<semaphore_mem>> -> memref<1x!tpu.dma_semaphore, #tpu.memory_space<semaphore_mem>>
    %3 = tpu.memref_squeeze %2 : memref<1x!tpu.dma_semaphore, #tpu.memory_space<semaphore_mem>> -> memref<!tpu.dma_semaphore, #tpu.memory_space<semaphore_mem>>
    tpu.wait_dma2 semaphore(%3 : memref<!tpu.dma_semaphore, #tpu.memory_space<semaphore_mem>>) src(%arg0 : memref<2x4x16x16xf32, #tpu.memory_space<any>>) dst(%arg1 : memref<2x4x16x16xf32, #tpu.memory_space<any>>)
    return
  }
}

</mosaic_0001>

<bundles_post_ra>
// kernel: tpu_custom_call.1
= control target key start
LH: loop header
LB: loop body
LE: loop exit
PB: predicated region body
PF: predicated region fallthrough
CT: control target
= control target key end

     0   :  { %s30_s6 = smov [#allocation2]   ;;  %s31_s7 = smov 131072   ;;  %s49_s0 = inlined_call_operand.hbm [shape: f32[2,4,16,16], index: 0, kind: input, shape index: {}]   ;;  %s50_s1 = inlined_call_operand.hbm [shape: f32[2,4,16,16], index: 1, kind: output, shape index: {}]  }
   0x1   :  { %s32_s8 = smov 0  }
   0x2   :  { %12 = dma.general %s49_s0, 2048, %s50_s1, %s30_s6, %s31_s7, [#allocation4], %s32_s8, 0  }
   0x3   :  { %28 = dma.done.wait [#allocation2], 2048 }
   0x4   :  { %29 = vsyncadd [#allocation2], 4294965248 }
   0x5   :  { %18 = vsyncmov [#allocation2] }
   0x8   :  { %s19_s13 = vpop.sfrf %18 }
   0x9   :  { %p24_p0 = scmp.ne.s32.totalorder %s19_s13, 0 }
   0xb   :  { %23 = shalt.err (%p24_p0)  }

</bundles_post_ra>
